<compile_context>
chip_gen: v7x
topology: tpu7x:2x2x1
jax: 0.10.0
libtpu: 0.0.40
codegen_flags: <defaults>
</compile_context>

<pallas_src>
import jax
import jax.numpy as jnp
import numpy as np
from jax.experimental import pallas as pl
from jax.experimental.pallas import tpu as pltpu


# ---------------------------------------------------------------------------
# Kernel: streaming copy of one lane-dense (nb, lt) tile.  The PixelShuffle
# "rearrangement" is the identity on contiguous per-batch memory, so no
# in-kernel shuffles / concatenates / slices are needed.
# ---------------------------------------------------------------------------
def _copy_kernel(x_ref, o_ref):
    o_ref[...] = x_ref[...]


# ---------------------------------------------------------------------------
# Block-shape selection
# ---------------------------------------------------------------------------
_TILE_BUDGET_BYTES = 2 * 1024 * 1024  # per-buffer tile budget; 4x (in/out,
                                      # double-buffered) stays < 8 MiB VMEM.


def _pick_lane_tile(M, itemsize):
    """Lane-axis block: full row, or a 128-multiple that divides the row."""
    if M % 128 != 0:
        # Block must equal the full dim when it is not a multiple of 128.
        return M
    cap = max(128, _TILE_BUDGET_BYTES // itemsize)
    if M <= cap:
        return M
    best = 128
    t = 128
    while t <= cap:
        if M % t == 0:
            best = t  # largest 128-multiple divisor of M under the cap
        t += 128
    return best


def _pick_batch_tile(N, lt, itemsize):
    """Sublane-axis block: full N when small, else a multiple of 8 sized to
    the remaining byte budget."""
    if N <= 8:
        return N
    rows = _TILE_BUDGET_BYTES // max(1, lt * itemsize)
    nb = (rows // 8) * 8
    nb = max(8, min(nb, (N // 8) * 8 if N % 8 == 0 else N // 8 * 8 + 8))
    return min(nb, N) if N % 8 == 0 else max(8, min(nb, N - (N % 8) + 8) - 8) or 8


# ---------------------------------------------------------------------------
# Wrapper
# ---------------------------------------------------------------------------
def pixel_shuffle(x):
    """x: (N, C, W) -> (N, C // 2, 2 * W), matching the PyTorch forward."""
    N, C, W = x.shape
    assert C % 2 == 0, "channel dim must be even (forward hard-codes factor 2)"
    M = C * W
    itemsize = jnp.dtype(x.dtype).itemsize

    # Present the data as a lane-dense 2-D slab: batch on sublanes,
    # the whole per-batch payload (C*W elements) on lanes.
    flat = x.reshape(N, M)

    lt = _pick_lane_tile(M, itemsize)
    if N <= 8:
        nb = N
    else:
        rows = _TILE_BUDGET_BYTES // max(1, lt * itemsize)
        nb = max(8, (rows // 8) * 8)
        nb = min(nb, N if N % 8 == 0 else N)  # ragged last batch block is masked
        # keep nb a multiple of 8 unless it equals the full dim
        if nb != N:
            nb = max(8, (nb // 8) * 8)

    grid = (pl.cdiv(N, nb), pl.cdiv(M, lt))

    out_flat = pl.pallas_call(
        _copy_kernel,
        out_shape=jax.ShapeDtypeStruct((N, M), x.dtype),
        grid_spec=pltpu.PrefetchScalarGridSpec(
            num_scalar_prefetch=0,
            grid=grid,
            in_specs=[pl.BlockSpec((nb, lt), lambda i, j: (i, j))],
            out_specs=pl.BlockSpec((nb, lt), lambda i, j: (i, j)),
        ),
        compiler_params=pltpu.CompilerParams(
            dimension_semantics=("parallel", "parallel"),
            vmem_limit_bytes=32 * 1024 * 1024,
        ),
    )(flat)

    return out_flat.reshape(N, C // 2, 2 * W)


# ---------------------------------------------------------------------------
# Explicit-index reference (no reshape) proving the view semantics:
#   out[n, c, 0:W] = x[n, 2c, :],  out[n, c, W:2W] = x[n, 2c+1, :]
# ---------------------------------------------------------------------------
def pixel_shuffle_ref(x):
    return jnp.concatenate([x[:, 0::2, :], x[:, 1::2, :]], axis=2)


# ---------------------------------------------------------------------------
if __name__ == "__main__":
    key = jax.random.PRNGKey(0)
    k1, k2, k3 = jax.random.split(key, 3)

    # Small shape consistent with the module's 3-D (N, C, W) input.
    x_small = jax.random.normal(k1, (2, 4, 16), jnp.float32)
    out_small = jax.block_until_ready(pixel_shuffle(x_small))
    assert out_small.shape == (2, 2, 32)
    assert np.array_equal(np.asarray(out_small),
                          np.asarray(pixel_shuffle_ref(x_small))), \
        "Pallas output mismatch vs explicit-index reference (small)"

    # Larger shape exercising the lane-tiled (multiple-of-128) + batch-tiled path.
    x_big = jax.random.normal(k2, (32, 8, 1024), jnp.float32)
    out_big = jax.block_until_ready(pixel_shuffle(x_big))
    assert out_big.shape == (32, 4, 2048)
    assert np.array_equal(np.asarray(out_big),
                          np.asarray(pixel_shuffle_ref(x_big))), \
        "Pallas output mismatch vs explicit-index reference (big)"

    # Non-128-multiple row length (full-row lane block path).
    x_odd = jax.random.normal(k3, (3, 6, 37), jnp.float32)
    out_odd = jax.block_until_ready(pixel_shuffle(x_odd))
    assert out_odd.shape == (3, 3, 74)
    assert np.array_equal(np.asarray(out_odd),
                          np.asarray(pixel_shuffle_ref(x_odd))), \
        "Pallas output mismatch vs explicit-index reference (odd)"

    print("KERNEL_OK")
</pallas_src>

<mosaic_0001>
module attributes {stable_mosaic.version = 11 : i64} {
  func.func @_copy_kernel(%arg0: i32, %arg1: i32, %arg2: memref<2x64xf32, #tpu.memory_space<vmem>>, %arg3: memref<2x64xf32, #tpu.memory_space<vmem>>) attributes {dimension_semantics = [#tpu.dimension_semantics<parallel>, #tpu.dimension_semantics<parallel>], iteration_bounds = array<i64: 1, 1>, scalar_prefetch = 0 : i64, scratch_operands = 0 : i64, tpu.core_type = #tpu.core_type<tc>, window_params = [{transform_indices = @transform_0, window_bounds = array<i64: 2, 64>}, {transform_indices = @transform_1, window_bounds = array<i64: 2, 64>}]} {
    %c0 = arith.constant 0 : index
    %c0_0 = arith.constant 0 : index
    %0 = vector.load %arg2[%c0, %c0_0] : memref<2x64xf32, #tpu.memory_space<vmem>>, vector<2x64xf32>
    %c0_1 = arith.constant 0 : index
    %c0_2 = arith.constant 0 : index
    %1 = vector.load %arg3[%c0_1, %c0_2] : memref<2x64xf32, #tpu.memory_space<vmem>>, vector<2x64xf32>
    tpu.vector_store %arg3[%c0_1, %c0_2], %0 {strides = array<i32>} : memref<2x64xf32, #tpu.memory_space<vmem>>, vector<2x64xf32>,
    return
  }
  func.func @transform_0(%arg0: i32, %arg1: i32) -> (i32, i32) {
    %c0_i32 = arith.constant 0 : i32
    return %arg0, %arg1 : i32, i32
  }
  func.func @transform_1(%arg0: i32, %arg1: i32) -> (i32, i32) {
    %c0_i32 = arith.constant 0 : i32
    return %arg0, %arg1 : i32, i32
  }
}

</mosaic_0001>

<bundles_post_ra>
// kernel: tpu_custom_call.1
= control target key start
LH: loop header
LB: loop body
LE: loop exit
PB: predicated region body
PF: predicated region fallthrough
CT: control target
= control target key end

     0   :  { %6 = vsyncpa [#allocation3], 0  ;;  %s125_s0 = inlined_call_operand.hbm [shape: f32[2,64], index: 0, kind: input, shape index: {}]   ;;  %s126_s1 = inlined_call_operand.hbm [shape: f32[2,64], index: 1, kind: output, shape index: {}]  }
   0x1   :  { %7 = vsyncpa [#allocation4], 0  ;;  %s89_s6 = smov [#allocation2]   ;;  %s41_s10 = scalar_lea.hbm %s125_s0, 32 }
   0x2   :  { %s14_s7 = sshll.u32 %s89_s6, 4  ;;  %p42_p0 = scmp.ne.s32.totalorder %s125_s0, %s41_s10  ;;  %s15_s7 = int_to_ptr.vmem [resolvable:$true] %s14_s7 }
   0x3   :  { %p45_p1 = scmp.lt.u32.totalorder %s41_s10, %s125_s0 }
   0x5   :  { %p47_p2 = pnand %p45_p1, %p42_p0 }
   0x7   :  { %50 = shalt.err (!%p47_p2)
}
   0x8   :  { %s51_s15 = scalar_lea.vmem %s15_s7, 32  ;;  %p56_p4 = scmp.lt.s32.totalorder %s15_s7, %s15_s7 }
   0x9   :  { %p52_p3 = scmp.ne.s32.totalorder %s15_s7, %s51_s15  ;;  %p57_p5 = scmp.lt.s32.totalorder %s51_s15, %s51_s15 }
   0xb   :  { %p58_p6 = por %p57_p5, %p56_p4 }
   0xd   :  { %p59_p7 = pnand %p58_p6, %p52_p3 }
   0xf   :  { %62 = shalt.err (!%p59_p7)
}
  0x10   :  { %17 = dma.hbm_to_vmem [thread:$0]  %s125_s0, 32, %s15_s7, [#allocation3]  }
  0x11   :  { %85 = dma.done.wait [#allocation3], 32  }
  0x12   :  { %86 = vsyncadd [#allocation3], 4294967264  ;;  %s90_s18 = smov [#allocation5]   ;;  %vm22_vm0 = vcmask 517120   ;;  %v21_v0 = vld [vmem:[#allocation2] sm:$0x3] }
  0x13   :  { %s30_s19 = sshll.u32 %s90_s18, 4  ;;  %23 = vst.msk [vmem:[#allocation5] sm:$0x3] %vm22_vm0, %v21_v0  ;;  %s31_s19 = int_to_ptr.vmem [resolvable:$true] %s30_s19 }
  0x14   :  { %s63_s20 = scalar_lea.vmem %s31_s19, 32  ;;  %p68_p9 = scmp.lt.s32.totalorder %s31_s19, %s31_s19 }
  0x15   :  { %p64_p8 = scmp.ne.s32.totalorder %s31_s19, %s63_s20  ;;  %p69_p10 = scmp.lt.s32.totalorder %s63_s20, %s63_s20 }
  0x17   :  { %p70_p11 = por %p69_p10, %p68_p9 }
  0x19   :  { %p71_p12 = pnand %p70_p11, %p64_p8 }
  0x1b   :  { %74 = shalt.err (!%p71_p12)
}
  0x1c   :  { %s75_s23 = scalar_lea.hbm %s126_s1, 32 }
  0x1d   :  { %p76_p13 = scmp.ne.s32.totalorder %s126_s1, %s75_s23  ;;  %p79_p0 = scmp.lt.u32.totalorder %s75_s23, %s126_s1 }
  0x1f   :  { %p81_p1 = pnand %p79_p0, %p76_p13 }
  0x21   :  { %84 = shalt.err (!%p81_p1)
}
  0x22   :  { %33 = dma.vmem_to_hbm [thread:$0]  %s31_s19, 32, %s126_s1, [#allocation4]  }
  0x23   :  { %87 = dma.done.wait [#allocation4], 32  }
  0x24   :  { %88 = vsyncadd [#allocation4], 4294967264 }
  0x25   :  { %37 = vsyncpa [#allocation3], 1 }
  0x26   :  { %38 = vsyncpa [#allocation4], 1 }

</bundles_post_ra>
